<compile_context>
chip_gen: v7x
topology: tpu7x:2x2x1
jax: 0.10.0
libtpu: 0.0.40
codegen_flags: <defaults>
</compile_context>

<pallas_src>
import functools

import jax
import jax.numpy as jnp
from jax.experimental import pallas as pl
from jax.experimental.pallas import tpu as pltpu

LANE = 128          # TPU lane width
MIB = 1024 * 1024


def _round_up(n, m):
    return ((n + m - 1) // m) * m


# ----------------------------------------------------------------------------
# Per-generation configuration
# ----------------------------------------------------------------------------
def _chip_config():
    """Returns (vmem_limit_bytes, max_batch_tile, epilogue_dtype) for this chip."""
    kind = ""
    try:
        kind = jax.devices()[0].device_kind.lower()
    except Exception:
        pass
    old_gen = any(f"v{g}" in kind for g in (2, 3, 4, 5))   # pre-v6: no bf16 VALU
    big_vmem = old_gen or ("v6" in kind)                    # 128 MiB VMEM; v7x: 64 MiB/TC
    vmem_limit = 100 * MIB if big_vmem else 48 * MIB
    max_tile_b = 1024 if big_vmem else 512
    try:  # cross-check against the reported VMEM capacity when available
        cap = int(pltpu.get_tpu_info().vmem_capacity_bytes)
        vmem_limit = min(vmem_limit, int(0.8 * cap))
    except Exception:
        pass
    epilogue_dtype = jnp.bfloat16 if (kind and not old_gen) else jnp.float32
    return vmem_limit, max_tile_b, epilogue_dtype


# ----------------------------------------------------------------------------
# Pallas kernel
# ----------------------------------------------------------------------------
def _ffn_kernel(num_hidden_layers, epilogue_dtype, x_ref, *refs):
    """Fused MLP forward over one batch tile.

    refs layout (after x_ref):
      num_hidden_layers groups of 2:
        w_ref  [in, hid_pad]       bf16   (Linear weight with BN scale folded in)
        t_ref  [1, hid_pad]        f32    (folded bias/shift = b*scale + shift)
      final Linear:
        wo_ref [hid_pad, out_pad]  bf16,  bo_ref [1, out_pad] f32
      refs[-1] : o_ref [TILE_B, out_pad] f32
    """
    o_ref = refs[-1]
    params = refs[:-1]

    h = x_ref[...]                       # already bf16 (cast in the wrapper)

    idx = 0
    for _ in range(num_hidden_layers):
        w_ref, t_ref = params[idx], params[idx + 1]
        idx += 2
        if epilogue_dtype == jnp.bfloat16:
            # MXU accumulates in f32 internally and emits bf16 on the result path;
            # bias-add + ReLU run as packed bf16 VALU ops (v6e/v7x).
            a = jnp.dot(h, w_ref[...], preferred_element_type=jnp.bfloat16)
            h = jnp.maximum(a + t_ref[...].astype(jnp.bfloat16), 0.0)
        else:
            # v5e path (no bf16 VALU): f32 accumulation + f32 epilogue, cast for next MXU.
            a = jnp.dot(h, w_ref[...], preferred_element_type=jnp.float32)
            h = jnp.maximum(a + t_ref[...], 0.0).astype(jnp.bfloat16)
        # Dropout: identity in eval mode.

    wo_ref, bo_ref = params[idx], params[idx + 1]
    out = jnp.dot(h, wo_ref[...], preferred_element_type=jnp.float32) + bo_ref[...]
    o_ref[...] = out.astype(o_ref.dtype)


# ----------------------------------------------------------------------------
# One-time parameter packing (fold BN/bias, pad lane dims, cast to bf16)
# ----------------------------------------------------------------------------
def pack_params(params, num_hidden_layers):
    """params: flat list (unfolded, f32) matching init_params:
         per hidden layer: w [in, hid], b [1, hid], scale [1, hid], shift [1, hid]
         then wo [hid, out], bo [1, out]
    Returns the packed/folded list consumed by balanced_ffn_forward.
    Run once outside the serving path so weights are read from HBM exactly once per call.
    """
    # TODO(synk): optional int8 weight path for v5e/v6e (native int MXU) to halve
    #             weight DMA bytes at small serving batch; not applicable on v7x.
    packed = []
    idx = 0
    for li in range(num_hidden_layers):
        w, b, s, t = params[idx:idx + 4]
        idx += 4
        d_in, d_out = w.shape
        d_out_p = _round_up(d_out, LANE)
        # First layer's contraction dim is left unpadded so x needs no lane padding.
        d_in_p = d_in if li == 0 else _round_up(d_in, LANE)
        w_f = w * s                      # fold BN scale into weight columns
        t_f = b * s + t                  # folded bias + BN shift
        w_p = jnp.zeros((d_in_p, d_out_p), jnp.float32).at[:d_in, :d_out].set(w_f)
        t_p = jnp.zeros((1, d_out_p), jnp.float32).at[:, :d_out].set(t_f)
        packed.extend([w_p.astype(jnp.bfloat16), t_p])

    wo, bo = params[idx], params[idx + 1]
    d_in, d_out = wo.shape
    d_in_p, d_out_p = _round_up(d_in, LANE), _round_up(d_out, LANE)
    wo_p = jnp.zeros((d_in_p, d_out_p), jnp.float32).at[:d_in, :d_out].set(wo)
    bo_p = jnp.zeros((1, d_out_p), jnp.float32).at[:, :d_out].set(bo)
    packed.extend([wo_p.astype(jnp.bfloat16), bo_p])
    return packed


# ----------------------------------------------------------------------------
# Batch-tile selection with an explicit VMEM budget check
# ----------------------------------------------------------------------------
def _choose_tile_b(batch, max_tile_b, vmem_budget, bytes_in_row, bytes_out_row,
                   bytes_scratch_row, resident_weight_bytes):
    if batch <= 128:
        tile = max(8, _round_up(batch, 8))       # (8,128) rule: batch tile multiple of 8
    else:
        # largest 128-multiple that still yields >= 2 grid steps (v7x megacore), capped
        half = _round_up(batch, 128) // 2
        tile = min(max_tile_b, max(128, (half // 128) * 128))

    def footprint(t):
        return (resident_weight_bytes
                + 2 * t * bytes_in_row           # double-buffered x tile
                + 2 * t * bytes_out_row          # double-buffered out tile
                + t * bytes_scratch_row)         # live intermediates inside the body

    while tile > 8 and footprint(tile) > vmem_budget:
        tile = (max(8, (tile // 2) // 8 * 8) if tile <= 128
                else max(128, (tile // 2) // 128 * 128))
    # TODO(synk): if resident weights alone exceed the budget (very large hidden_dim on
    #             v7x), fall back to K-tiling the hidden matmuls with pltpu.emit_pipeline
    #             instead of keeping every layer VMEM-resident.
    return tile


# ----------------------------------------------------------------------------
# Forward pass (packed params)
# ----------------------------------------------------------------------------
def _forward_packed(x, packed, num_hidden_layers, output_dim, *, epilogue_dtype,
                    single_buffer_weights, vmem_limit, max_tile_b):
    batch, input_dim = x.shape
    hid_pad = packed[0].shape[-1]
    out_pad = packed[-1].shape[-1]

    weight_bytes = sum(int(p.size) * p.dtype.itemsize for p in packed)
    resident = weight_bytes * (1 if single_buffer_weights else 2)
    tile_b = _choose_tile_b(
        batch, max_tile_b, vmem_limit - 2 * MIB,
        bytes_in_row=input_dim * 2,
        bytes_out_row=out_pad * 4,
        bytes_scratch_row=hid_pad * 8 + out_pad * 8,
        resident_weight_bytes=resident)
    b_pad = _round_up(batch, tile_b)
    n_tiles = b_pad // tile_b

    # bf16 activations into the MXU; pad only the batch dim (x keeps its true feature dim,
    # so no lane-padded HBM copy of x is ever materialized).
    x_p = x.astype(jnp.bfloat16)
    if b_pad != batch:
        x_p = jnp.pad(x_p, ((0, b_pad - batch), (0, 0)))

    def _weight_spec(shape):
        if single_buffer_weights:
            # Constant block index -> VMEM-resident; single-buffer to halve weight VMEM.
            return pl.BlockSpec(shape, lambda i: (0, 0), pipeline_mode=pl.Buffered(1))
        return pl.BlockSpec(shape, lambda i: (0, 0))

    in_specs = [pl.BlockSpec((tile_b, input_dim), lambda i: (i, 0))]
    in_specs += [_weight_spec(p.shape) for p in packed]
    out_spec = pl.BlockSpec((tile_b, out_pad), lambda i: (i, 0))

    # rough cost hint for the XLA scheduler
    flops = 0
    for l in range(num_hidden_layers):
        di, do = packed[2 * l].shape
        flops += 2 * b_pad * di * do
    flops += 2 * b_pad * packed[-2].shape[0] * packed[-2].shape[1]
    bytes_acc = int(x_p.size) * 2 + b_pad * out_pad * 4 + weight_bytes
    cost = pl.CostEstimate(flops=flops, transcendentals=0, bytes_accessed=bytes_acc)

    kernel = functools.partial(_ffn_kernel, num_hidden_layers, epilogue_dtype)
    out_p = pl.pallas_call(
        kernel,
        out_shape=jax.ShapeDtypeStruct((b_pad, out_pad), jnp.float32),
        grid=(n_tiles,),
        in_specs=in_specs,
        out_specs=out_spec,
        compiler_params=pltpu.CompilerParams(
            dimension_semantics=("parallel",),   # shard batch tiles across v7x TCs
            vmem_limit_bytes=vmem_limit,
        ),
        cost_estimate=cost,
    )(x_p, *packed)

    # slice away batch / lane padding outside the kernel
    return out_p[:batch, :output_dim]


def balanced_ffn_forward(x, packed_params, num_hidden_layers, output_dim):
    """Forward pass with pre-packed parameters (see pack_params)."""
    vmem_limit, max_tile_b, epilogue_dtype = _chip_config()
    try:
        out = _forward_packed(x, packed_params, num_hidden_layers, output_dim,
                              epilogue_dtype=epilogue_dtype,
                              single_buffer_weights=True,
                              vmem_limit=vmem_limit, max_tile_b=max_tile_b)
        return jax.block_until_ready(out)
    except Exception:
        # Conservative fallback (default double-buffering, f32 epilogue) in case the
        # local jax/libtpu rejects pl.Buffered(1) or the bf16-result matmul.
        return _forward_packed(x, packed_params, num_hidden_layers, output_dim,
                               epilogue_dtype=jnp.float32,
                               single_buffer_weights=False,
                               vmem_limit=vmem_limit, max_tile_b=max_tile_b)


# ----------------------------------------------------------------------------
# Deterministic parameter construction (matches BalancedFFN.__init__ shapes)
# ----------------------------------------------------------------------------
def init_params(key, input_dim, output_dim, hidden_dim, num_layers):
    """Kaiming-normal (fan_in, relu) Linear weights, zero bias; fresh BatchNorm."""
    bn_eps = 1e-5
    params = []

    dims = [input_dim] + [hidden_dim] * num_layers
    keys = jax.random.split(key, num_layers + 1)

    for li in range(num_layers):
        fan_in, fan_out = dims[li], dims[li + 1]
        std = (2.0 / fan_in) ** 0.5  # kaiming_normal_, mode='fan_in', relu
        w = std * jax.random.normal(keys[li], (fan_in, fan_out), jnp.float32)  # pre-transposed
        b = jnp.zeros((1, fan_out), jnp.float32)
        # BatchNorm1d at init: gamma=1, beta=0, running_mean=0, running_var=1
        gamma = jnp.ones((fan_out,), jnp.float32)
        beta = jnp.zeros((fan_out,), jnp.float32)
        run_mean = jnp.zeros((fan_out,), jnp.float32)
        run_var = jnp.ones((fan_out,), jnp.float32)
        scale = (gamma / jnp.sqrt(run_var + bn_eps)).reshape(1, fan_out)
        shift = (beta - run_mean * scale[0]).reshape(1, fan_out)
        params.extend([w, b, scale, shift])

    std = (2.0 / hidden_dim) ** 0.5
    wo = std * jax.random.normal(keys[-1], (hidden_dim, output_dim), jnp.float32)
    bo = jnp.zeros((1, output_dim), jnp.float32)
    params.extend([wo, bo])
    return params


# ----------------------------------------------------------------------------
# Pure-JAX f32 reference (eval semantics) for sanity checking
# ----------------------------------------------------------------------------
def reference_forward(x, params, num_hidden_layers):
    h = x
    idx = 0
    for _ in range(num_hidden_layers):
        w, b, s, t = params[idx:idx + 4]
        idx += 4
        h = jnp.maximum((h @ w + b) * s + t, 0.0)
    wo, bo = params[idx], params[idx + 1]
    return h @ wo + bo


if __name__ == "__main__":
    # Small shapes consistent with the module's forward: x is [batch, input_dim].
    batch, input_dim, output_dim, hidden_dim, num_layers = 8, 32, 16, 128, 3

    key = jax.random.PRNGKey(0)
    k_param, k_x = jax.random.split(key)

    params = init_params(k_param, input_dim, output_dim, hidden_dim, num_layers)
    x = jax.random.normal(k_x, (batch, input_dim), jnp.float32)

    # One-time parameter packing (the serving path reuses `packed` across calls).
    packed = pack_params(params, num_layers)
    packed = jax.block_until_ready(packed)

    out = balanced_ffn_forward(x, packed, num_layers, output_dim)
    out = jax.block_until_ready(out)

    ref = reference_forward(x, params, num_layers)
    assert out.shape == (batch, output_dim)
    # bf16 matmul inputs with MXU accumulation -> loosened tolerance vs pure-f32 reference
    assert jnp.allclose(out, ref, atol=5e-2, rtol=5e-2), "mismatch vs reference"

    print("KERNEL_OK")
</pallas_src>

<mosaic_0001>
module attributes {stable_mosaic.version = 11 : i64} {
  func.func @_ffn_kernel(%arg0: i32, %arg1: memref<8x32xbf16, #tpu.memory_space<vmem>>, %arg2: memref<32x128xbf16, #tpu.memory_space<vmem>>, %arg3: memref<1x128xf32, #tpu.memory_space<vmem>>, %arg4: memref<128x128xbf16, #tpu.memory_space<vmem>>, %arg5: memref<1x128xf32, #tpu.memory_space<vmem>>, %arg6: memref<128x128xbf16, #tpu.memory_space<vmem>>, %arg7: memref<1x128xf32, #tpu.memory_space<vmem>>, %arg8: memref<128x128xbf16, #tpu.memory_space<vmem>>, %arg9: memref<1x128xf32, #tpu.memory_space<vmem>>, %arg10: memref<8x128xf32, #tpu.memory_space<vmem>>) attributes {dimension_semantics = [#tpu.dimension_semantics<parallel>], iteration_bounds = array<i64: 1>, scalar_prefetch = 0 : i64, scratch_operands = 0 : i64, tpu.core_type = #tpu.core_type<tc>, window_params = [{transform_indices = @transform_0, window_bounds = array<i64: 8, 32>}, {pipeline_mode = #tpu.pipeline_mode<synchronous>, transform_indices = @transform_1, window_bounds = array<i64: 32, 128>}, {pipeline_mode = #tpu.pipeline_mode<synchronous>, transform_indices = @transform_2, window_bounds = array<i64: 1, 128>}, {pipeline_mode = #tpu.pipeline_mode<synchronous>, transform_indices = @transform_3, window_bounds = array<i64: 128, 128>}, {pipeline_mode = #tpu.pipeline_mode<synchronous>, transform_indices = @transform_4, window_bounds = array<i64: 1, 128>}, {pipeline_mode = #tpu.pipeline_mode<synchronous>, transform_indices = @transform_5, window_bounds = array<i64: 128, 128>}, {pipeline_mode = #tpu.pipeline_mode<synchronous>, transform_indices = @transform_6, window_bounds = array<i64: 1, 128>}, {pipeline_mode = #tpu.pipeline_mode<synchronous>, transform_indices = @transform_7, window_bounds = array<i64: 128, 128>}, {pipeline_mode = #tpu.pipeline_mode<synchronous>, transform_indices = @transform_8, window_bounds = array<i64: 1, 128>}, {transform_indices = @transform_9, window_bounds = array<i64: 8, 128>}]} {
    %c0 = arith.constant 0 : index
    %c0_0 = arith.constant 0 : index
    %0 = vector.load %arg1[%c0, %c0_0] : memref<8x32xbf16, #tpu.memory_space<vmem>>, vector<8x32xbf16>
    %c0_1 = arith.constant 0 : index
    %c0_2 = arith.constant 0 : index
    %1 = vector.load %arg2[%c0_1, %c0_2] : memref<32x128xbf16, #tpu.memory_space<vmem>>, vector<32x128xbf16>
    %cst = arith.constant dense<0.000000e+00> : vector<8x128xf32>
    %2 = tpu.matmul %0, %1, %cst {dimension_numbers = #tpu.dot_dimension_numbers<[1], [0], [0], [1], [0, 0, 1, 1], [], []>} : vector<8x32xbf16>, vector<32x128xbf16>, vector<8x128xf32> -> vector<8x128xf32>
    %c0_3 = arith.constant 0 : index
    %c0_4 = arith.constant 0 : index
    %3 = vector.load %arg3[%c0_3, %c0_4] : memref<1x128xf32, #tpu.memory_space<vmem>>, vector<1x128xf32>
    %4 = vector.broadcast %3 : vector<1x128xf32> to vector<8x128xf32>
    %5 = arith.addf %2, %4 : vector<8x128xf32>
    %cst_5 = arith.constant 0.000000e+00 : f32
    %6 = vector.broadcast %cst_5 : f32 to vector<8x128xf32>
    %7 = arith.maximumf %5, %6 : vector<8x128xf32>
    %8 = arith.truncf %7 : vector<8x128xf32> to vector<8x128xbf16>
    %c0_6 = arith.constant 0 : index
    %c0_7 = arith.constant 0 : index
    %9 = vector.load %arg4[%c0_6, %c0_7] : memref<128x128xbf16, #tpu.memory_space<vmem>>, vector<128x128xbf16>
    %cst_8 = arith.constant dense<0.000000e+00> : vector<8x128xf32>
    %10 = tpu.matmul %8, %9, %cst_8 {dimension_numbers = #tpu.dot_dimension_numbers<[1], [0], [0], [1], [0, 0, 1, 1], [], []>} : vector<8x128xbf16>, vector<128x128xbf16>, vector<8x128xf32> -> vector<8x128xf32>
    %c0_9 = arith.constant 0 : index
    %c0_10 = arith.constant 0 : index
    %11 = vector.load %arg5[%c0_9, %c0_10] : memref<1x128xf32, #tpu.memory_space<vmem>>, vector<1x128xf32>
    %12 = vector.broadcast %11 : vector<1x128xf32> to vector<8x128xf32>
    %13 = arith.addf %10, %12 : vector<8x128xf32>
    %cst_11 = arith.constant 0.000000e+00 : f32
    %14 = vector.broadcast %cst_11 : f32 to vector<8x128xf32>
    %15 = arith.maximumf %13, %14 : vector<8x128xf32>
    %16 = arith.truncf %15 : vector<8x128xf32> to vector<8x128xbf16>
    %c0_12 = arith.constant 0 : index
    %c0_13 = arith.constant 0 : index
    %17 = vector.load %arg6[%c0_12, %c0_13] : memref<128x128xbf16, #tpu.memory_space<vmem>>, vector<128x128xbf16>
    %cst_14 = arith.constant dense<0.000000e+00> : vector<8x128xf32>
    %18 = tpu.matmul %16, %17, %cst_14 {dimension_numbers = #tpu.dot_dimension_numbers<[1], [0], [0], [1], [0, 0, 1, 1], [], []>} : vector<8x128xbf16>, vector<128x128xbf16>, vector<8x128xf32> -> vector<8x128xf32>
    %c0_15 = arith.constant 0 : index
    %c0_16 = arith.constant 0 : index
    %19 = vector.load %arg7[%c0_15, %c0_16] : memref<1x128xf32, #tpu.memory_space<vmem>>, vector<1x128xf32>
    %20 = vector.broadcast %19 : vector<1x128xf32> to vector<8x128xf32>
    %21 = arith.addf %18, %20 : vector<8x128xf32>
    %cst_17 = arith.constant 0.000000e+00 : f32
    %22 = vector.broadcast %cst_17 : f32 to vector<8x128xf32>
    %23 = arith.maximumf %21, %22 : vector<8x128xf32>
    %24 = arith.truncf %23 : vector<8x128xf32> to vector<8x128xbf16>
    %c0_18 = arith.constant 0 : index
    %c0_19 = arith.constant 0 : index
    %25 = vector.load %arg8[%c0_18, %c0_19] : memref<128x128xbf16, #tpu.memory_space<vmem>>, vector<128x128xbf16>
    %cst_20 = arith.constant dense<0.000000e+00> : vector<8x128xf32>
    %26 = tpu.matmul %24, %25, %cst_20 {dimension_numbers = #tpu.dot_dimension_numbers<[1], [0], [0], [1], [0, 0, 1, 1], [], []>} : vector<8x128xbf16>, vector<128x128xbf16>, vector<8x128xf32> -> vector<8x128xf32>
    %c0_21 = arith.constant 0 : index
    %c0_22 = arith.constant 0 : index
    %27 = vector.load %arg9[%c0_21, %c0_22] : memref<1x128xf32, #tpu.memory_space<vmem>>, vector<1x128xf32>
    %28 = vector.broadcast %27 : vector<1x128xf32> to vector<8x128xf32>
    %29 = arith.addf %26, %28 : vector<8x128xf32>
    %c0_23 = arith.constant 0 : index
    %c0_24 = arith.constant 0 : index
    %30 = vector.load %arg10[%c0_23, %c0_24] : memref<8x128xf32, #tpu.memory_space<vmem>>, vector<8x128xf32>
    tpu.vector_store %arg10[%c0_23, %c0_24], %29 {strides = array<i32>} : memref<8x128xf32, #tpu.memory_space<vmem>>, vector<8x128xf32>,
    return
  }
  func.func @transform_0(%arg0: i32) -> (i32, i32) {
    %c0_i32 = arith.constant 0 : i32
    %c0_i32_0 = arith.constant 0 : i32
    return %arg0, %c0_i32 : i32, i32
  }
  func.func @transform_1(%arg0: i32) -> (i32, i32) {
    %c0_i32 = arith.constant 0 : i32
    %c0_i32_0 = arith.constant 0 : i32
    %c0_i32_1 = arith.constant 0 : i32
    return %c0_i32, %c0_i32_0 : i32, i32
  }
  func.func @transform_2(%arg0: i32) -> (i32, i32) {
    %c0_i32 = arith.constant 0 : i32
    %c0_i32_0 = arith.constant 0 : i32
    %c0_i32_1 = arith.constant 0 : i32
    return %c0_i32, %c0_i32_0 : i32, i32
  }
  func.func @transform_3(%arg0: i32) -> (i32, i32) {
    %c0_i32 = arith.constant 0 : i32
    %c0_i32_0 = arith.constant 0 : i32
    %c0_i32_1 = arith.constant 0 : i32
    return %c0_i32, %c0_i32_0 : i32, i32
  }
  func.func @transform_4(%arg0: i32) -> (i32, i32) {
    %c0_i32 = arith.constant 0 : i32
    %c0_i32_0 = arith.constant 0 : i32
    %c0_i32_1 = arith.constant 0 : i32
    return %c0_i32, %c0_i32_0 : i32, i32
  }
  func.func @transform_5(%arg0: i32) -> (i32, i32) {
    %c0_i32 = arith.constant 0 : i32
    %c0_i32_0 = arith.constant 0 : i32
    %c0_i32_1 = arith.constant 0 : i32
    return %c0_i32, %c0_i32_0 : i32, i32
  }
  func.func @transform_6(%arg0: i32) -> (i32, i32) {
    %c0_i32 = arith.constant 0 : i32
    %c0_i32_0 = arith.constant 0 : i32
    %c0_i32_1 = arith.constant 0 : i32
    return %c0_i32, %c0_i32_0 : i32, i32
  }
  func.func @transform_7(%arg0: i32) -> (i32, i32) {
    %c0_i32 = arith.constant 0 : i32
    %c0_i32_0 = arith.constant 0 : i32
    %c0_i32_1 = arith.constant 0 : i32
    return %c0_i32, %c0_i32_0 : i32, i32
  }
  func.func @transform_8(%arg0: i32) -> (i32, i32) {
    %c0_i32 = arith.constant 0 : i32
    %c0_i32_0 = arith.constant 0 : i32
    %c0_i32_1 = arith.constant 0 : i32
    return %c0_i32, %c0_i32_0 : i32, i32
  }
  func.func @transform_9(%arg0: i32) -> (i32, i32) {
    %c0_i32 = arith.constant 0 : i32
    %c0_i32_0 = arith.constant 0 : i32
    return %arg0, %c0_i32 : i32, i32
  }
}

</mosaic_0001>

<bundles_post_ra>
// kernel: tpu_custom_call.1
= control target key start
LH: loop header
LB: loop body
LE: loop exit
PB: predicated region body
PF: predicated region fallthrough
CT: control target
= control target key end

     0   :  { %14 = vsyncpa [#allocation3], 0  ;;  %s1020_s0 = inlined_call_operand.hbm [shape: bf16[8,32], index: 0, kind: input, shape index: {}]   ;;  %s1021_s1 = inlined_call_operand.hbm [shape: bf16[32,128], index: 1, kind: input, shape index: {}]   ;;  %s1022_s2 = inlined_call_operand.vmem [shape: f32[1,128], index: 2, kind: input, shape index: {}]   ;;  %s1023_s3 = inlined_call_operand.hbm [shape: bf16[128,128], index: 3, kind: input, shape index: {}]   ;;  %s1024_s4 = inlined_call_operand.vmem [shape: f32[1,128], index: 4, kind: input, shape index: {}]   ;;  %s1025_s5 = inlined_call_operand.hbm [shape: bf16[128,128], index: 5, kind: input, shape index: {}]   ;;  %s1026_s6 = inlined_call_operand.vmem [shape: f32[1,128], index: 6, kind: input, shape index: {}]   ;;  %s1027_s7 = inlined_call_operand.hbm [shape: bf16[128,128], index: 7, kind: input, shape index: {}]   ;;  %s1028_s8 = inlined_call_operand.vmem [shape: f32[1,128], index: 8, kind: input, shape index: {}]   ;;  %s1029_s9 = inlined_call_operand.hbm [shape: f32[8,128], index: 9, kind: output, shape index: {}]  }
   0x1   :  { %15 = vsyncpa [#allocation6], 0 }
   0x2   :  { %16 = vsyncpa [#allocation9], 0 }
   0x3   :  { %17 = vsyncpa [#allocation4], 0  ;;  %s830_s30 = smov [#allocation5]   ;;  %s690_s13 = scalar_lea.hbm %s1021_s1, 256 }
   0x4   :  { %s33_s10 = sshll.u32 %s830_s30, 4  ;;  %p691_p0 = scmp.ne.s32.totalorder %s1021_s1, %s690_s13  ;;  %s34_s10 = int_to_ptr.vmem [resolvable:$true] %s33_s10 }
   0x5   :  { %p694_p1 = scmp.lt.u32.totalorder %s690_s13, %s1021_s1 }
   0x7   :  { %p696_p2 = pnand %p694_p1, %p691_p0 }
   0x9   :  { %699 = shalt.err (!%p696_p2)
}
   0xa   :  { %s700_s18 = scalar_lea.vmem %s34_s10, 256  ;;  %p705_p4 = scmp.lt.s32.totalorder %s34_s10, %s34_s10 }
   0xb   :  { %p701_p3 = scmp.ne.s32.totalorder %s34_s10, %s700_s18  ;;  %p706_p5 = scmp.lt.s32.totalorder %s700_s18, %s700_s18 }
   0xd   :  { %p707_p6 = por %p706_p5, %p705_p4 }
   0xf   :  { %p708_p7 = pnand %p707_p6, %p701_p3 }
  0x11   :  { %711 = shalt.err (!%p708_p7)
}
  0x12   :  { %s831_s19 = smov 64   ;;  %s832_s20 = smov 4  }
  0x13   :  { %39 = dma.hbm_to_vmem [thread:$0]  %s1021_s1, 256, %s34_s10, [#allocation6], %s831_s19, %s831_s19, %s832_s20  }
  0x14   :  { %s833_s23 = smov [#allocation8]   ;;  %s834_s25 = smov [#allocation2]  }
  0x15   :  { %s61_s24 = sshll.u32 %s833_s23, 4  ;;  %s24_s26 = sshll.u32 %s834_s25, 4  ;;  %s62_s24 = int_to_ptr.vmem [resolvable:$true] %s61_s24  ;;  %s25_s26 = int_to_ptr.vmem [resolvable:$true] %s24_s26 }
  0x16   :  { %s712_s29 = scalar_lea.hbm %s1025_s5, 1024 }
  0x17   :  { %p713_p8 = scmp.ne.s32.totalorder %s1025_s5, %s712_s29  ;;  %p716_p9 = scmp.lt.u32.totalorder %s712_s29, %s1025_s5 }
  0x19   :  { %p718_p10 = pnand %p716_p9, %p713_p8 }
  0x1b   :  { %721 = shalt.err (!%p718_p10)
}
  0x1c   :  { %s722_s1 = scalar_lea.vmem %s62_s24, 1024  ;;  %p727_p12 = scmp.lt.s32.totalorder %s62_s24, %s62_s24 }
  0x1d   :  { %p723_p11 = scmp.ne.s32.totalorder %s62_s24, %s722_s1  ;;  %p728_p13 = scmp.lt.s32.totalorder %s722_s1, %s722_s1 }
  0x1f   :  { %p729_p0 = por %p728_p13, %p727_p12 }
  0x21   :  { %p730_p1 = pnand %p729_p0, %p723_p11 }
  0x23   :  { %733 = shalt.err (!%p730_p1)
}
  0x24   :  { %67 = dma.hbm_to_vmem [thread:$0]  %s1025_s5, 1024, %s62_s24, [#allocation9], %s831_s19, %s831_s19, %s832_s20  }
  0x25   :  { %s734_s17 = scalar_lea.hbm %s1020_s0, 64 }
  0x26   :  { %p735_p2 = scmp.ne.s32.totalorder %s1020_s0, %s734_s17  ;;  %p738_p3 = scmp.lt.u32.totalorder %s734_s17, %s1020_s0 }
  0x28   :  { %p740_p4 = pnand %p738_p3, %p735_p2 }
  0x2a   :  { %743 = shalt.err (!%p740_p4)
}
  0x2b   :  { %s744_s25 = scalar_lea.vmem %s25_s26, 64  ;;  %p749_p6 = scmp.lt.s32.totalorder %s25_s26, %s25_s26 }
  0x2c   :  { %p745_p5 = scmp.ne.s32.totalorder %s25_s26, %s744_s25  ;;  %p750_p7 = scmp.lt.s32.totalorder %s744_s25, %s744_s25 }
  0x2e   :  { %p751_p8 = por %p750_p7, %p749_p6 }
  0x30   :  { %p752_p9 = pnand %p751_p8, %p745_p5 }
  0x32   :  { %755 = shalt.err (!%p752_p9)
}
  0x33   :  { %27 = dma.hbm_to_vmem [thread:$0]  %s1020_s0, 64, %s25_s26, [#allocation3]  }
  0x34   :  { %s835_s27 = smov [#allocation7]   ;;  %s836_s29 = smov [#allocation10]  }
  0x35   :  { %s47_s28 = sshll.u32 %s835_s27, 4  ;;  %s75_s30 = sshll.u32 %s836_s29, 4  ;;  %s48_s28 = int_to_ptr.vmem [resolvable:$true] %s47_s28  ;;  %s76_s30 = int_to_ptr.vmem [resolvable:$true] %s75_s30 }
  0x36   :  { %s756_s13 = scalar_lea.hbm %s1023_s3, 1024 }
  0x37   :  { %p757_p10 = scmp.ne.s32.totalorder %s1023_s3, %s756_s13  ;;  %p760_p11 = scmp.lt.u32.totalorder %s756_s13, %s1023_s3 }
  0x39   :  { %p762_p12 = pnand %p760_p11, %p757_p10 }
  0x3b   :  { %765 = shalt.err (!%p762_p12)
}
  0x3c   :  { %s766_s0 = scalar_lea.vmem %s48_s28, 1024  ;;  %p771_p0 = scmp.lt.s32.totalorder %s48_s28, %s48_s28 }
  0x3d   :  { %p767_p13 = scmp.ne.s32.totalorder %s48_s28, %s766_s0  ;;  %p772_p1 = scmp.lt.s32.totalorder %s766_s0, %s766_s0 }
  0x3f   :  { %p773_p2 = por %p772_p1, %p771_p0 }
  0x41   :  { %p774_p3 = pnand %p773_p2, %p767_p13 }
  0x43   :  { %777 = shalt.err (!%p774_p3)
}
  0x44   :  { %53 = dma.hbm_to_vmem [thread:$0]  %s1023_s3, 1024, %s48_s28, [#allocation6], %s831_s19, %s831_s19, %s832_s20  }
  0x45   :  { %s778_s21 = scalar_lea.hbm %s1027_s7, 1024 }
  0x46   :  { %p779_p4 = scmp.ne.s32.totalorder %s1027_s7, %s778_s21  ;;  %p782_p5 = scmp.lt.u32.totalorder %s778_s21, %s1027_s7 }
  0x48   :  { %p784_p6 = pnand %p782_p5, %p779_p4 }
  0x4a   :  { %787 = shalt.err (!%p784_p6)
}
  0x4b   :  { %s788_s24 = scalar_lea.vmem %s76_s30, 1024  ;;  %p793_p8 = scmp.lt.s32.totalorder %s76_s30, %s76_s30 }
  0x4c   :  { %p789_p7 = scmp.ne.s32.totalorder %s76_s30, %s788_s24  ;;  %p794_p9 = scmp.lt.s32.totalorder %s788_s24, %s788_s24 }
  0x4e   :  { %p795_p10 = por %p794_p9, %p793_p8 }
  0x50   :  { %p796_p11 = pnand %p795_p10, %p789_p7 }
  0x52   :  { %799 = shalt.err (!%p796_p11)
}
  0x53   :  { %81 = dma.hbm_to_vmem [thread:$0]  %s1027_s7, 1024, %s76_s30, [#allocation9], %s831_s19, %s831_s19, %s832_s20  }
  0x54   :  { %822 = dma.done.wait [#allocation3], 64  }
  0x55   :  { %823 = vsyncadd [#allocation3], 4294967232 }
  0x56   :  { %824 = dma.done.wait [#allocation6], 1280  }
  0x57   :  { %825 = vsyncadd [#allocation6], 4294966016 }
  0x58   :  { %826 = dma.done.wait [#allocation9], 2048  }
  0x59   :  { %827 = vsyncadd [#allocation9], 4294965248  ;;  %v837_v0 = vmov 0.0   ;;  %vm838_vm0 = vmmov 0   ;;  %v664_v1 = vld [vmem:[#allocation5] sm:$0xff]   ;;  %v665_v2 = vld [vmem:[#allocation5 + $0x8] sm:$0xff]  }
  0x5a   :  { %586 = vmatprep.subr.bf16.mxu0 %v837_v0  ;;  %590 = vmatprep.mubr.msk.bf16.mxu0 %vm838_vm0, %v837_v0  ;;  %v666_v3 = vld [vmem:[#allocation7] sm:$0xff]   ;;  %vm124_vm1 = vcmask 261120   ;;  %v667_v4 = vld [vmem:[#allocation7 + $0x8] sm:$0xff]   ;;  %v668_v6 = vld [vmem:[#allocation7 + $0x10] sm:$0xff]   ;;  %s839_s11 = smov [#allocation11]  }
  0x5b   :  { %594 = vmatprep.subr.bf16.mxu1 %v837_v0  ;;  %610 = vmatprep.mubr.msk.bf16.mxu1 %vm838_vm0, %v837_v0  ;;  %v100_v5 = vld [vmem:[#allocation2] sm:$0xf]  ;;  %v669_v7 = vld [vmem:[#allocation7 + $0x18] sm:$0xff]   ;;  %v670_v8 = vld [vmem:[#allocation7 + $0x20] sm:$0xff]   ;;  %s514_s12 = sshll.u32 %s839_s11, 4  ;;  %s515_s12 = int_to_ptr.vmem [resolvable:$true] %s514_s12 }
  0x5c   :  { %587 = vmatpush3.bf16.msra.mxu0 %v664_v1  ;;  %595 = vmatpush3.bf16.msra.mxu1 %v666_v3  ;;  %v671_v9 = vld [vmem:[#allocation7 + $0x28] sm:$0xff]   ;;  %v672_v10 = vld [vmem:[#allocation7 + $0x30] sm:$0xff]   ;;  %v673_v11 = vld [vmem:[#allocation7 + $0x38] sm:$0xff]   ;;  %p805_p13 = scmp.lt.s32.totalorder %s515_s12, %s515_s12 }
  0x5d   :  { %588 = vmatprep.subr.bf16.mxu0 %v837_v0  ;;  %596 = vmatprep.subr.bf16.mxu1 %v837_v0  ;;  %v674_v12 = vld [vmem:[#allocation8] sm:$0xff]   ;;  %v675_v13 = vld [vmem:[#allocation8 + $0x8] sm:$0xff]   ;;  %v676_v14 = vld [vmem:[#allocation8 + $0x10] sm:$0xff]  }
  0x5e   :  { %v677_v15 = vld [vmem:[#allocation8 + $0x18] sm:$0xff]   ;;  %v678_v16 = vld [vmem:[#allocation8 + $0x20] sm:$0xff]   ;;  %v679_v17 = vld [vmem:[#allocation8 + $0x28] sm:$0xff]  }
  0x5f   :  { %v525_v18 = vld [vmem:[%s1022_s2] ss:$0 sm:$0xff]  ;;  %v680_v26 = vld [vmem:[#allocation8 + $0x30] sm:$0xff]   ;;  %v681_v27 = vld [vmem:[#allocation8 + $0x38] sm:$0xff]  }
  0x60   :  { %589 = vmatpush3.bf16.msra.mxu0 %v665_v2  ;;  %597 = vmatpush3.bf16.msra.mxu1 %v667_v4  ;;  %v682_v28 = vld [vmem:[#allocation10] sm:$0xff]   ;;  %v683_v29 = vld [vmem:[#allocation10 + $0x8] sm:$0xff]   ;;  %v684_v30 = vld [vmem:[#allocation10 + $0x10] sm:$0xff]  }
  0x61   :  { %614 = vmatprep.subr.bf16.mxu0 %v837_v0  ;;  %598 = vmatprep.subr.bf16.mxu1 %v837_v0  ;;  %v685_v31 = vld [vmem:[#allocation10 + $0x18] sm:$0xff]   ;;  %v686_v32 = vld [vmem:[#allocation10 + $0x20] sm:$0xff]   ;;  %v687_v33 = vld [vmem:[#allocation10 + $0x28] sm:$0xff]  }
  0x62   :  { %v529_v34 = vld [vmem:[%s1024_s4] ss:$0 sm:$0xff]  ;;  %v688_v42 = vld [vmem:[#allocation10 + $0x30] sm:$0xff]   ;;  %v689_v43 = vld [vmem:[#allocation10 + $0x38] sm:$0xff]  }
  0x63   :  { %591 = vmatmul.mubr.msk.bf16.vlgmr.msra.gmra.mrb[0].mxu0 %vm124_vm1, %v100_v5  ;;  %v538_v44 = vld [vmem:[%s1026_s6] ss:$0 sm:$0xff]  ;;  %s800_s6 = scalar_lea.vmem %s515_s12, 128 }
  0x64   :  { %630 = vmatprep.mubr.msk.bf16.mxu0 %vm838_vm0, %v837_v0  ;;  %599 = vmatpush3.bf16.msra.mxu1 %v668_v6  ;;  %v547_v52 = vld [vmem:[%s1028_s8] ss:$0 sm:$0xff]  ;;  %p801_p12 = scmp.ne.s32.totalorder %s515_s12, %s800_s6  ;;  %p806_p0 = scmp.lt.s32.totalorder %s800_s6, %s800_s6 }
  0x65   :  { %600 = vmatprep.subr.bf16.mxu1 %v837_v0  ;;  %615 = vmatpush3.bf16.msra.mxu0 %v674_v12 }
  0x66   :  { %616 = vmatprep.subr.bf16.mxu0 %v837_v0  ;;  %p807_p1 = por %p806_p0, %p805_p13 }
  0x68   :  { %601 = vmatpush3.bf16.msra.mxu1 %v669_v7  ;;  %p808_p2 = pnand %p807_p1, %p801_p12 }
  0x69   :  { %602 = vmatprep.subr.bf16.mxu1 %v837_v0  ;;  %617 = vmatpush3.bf16.msra.mxu0 %v675_v13 }
  0x6a   :  { %618 = vmatprep.subr.bf16.mxu0 %v837_v0 }
  0x6c   :  { %603 = vmatpush3.bf16.msra.mxu1 %v670_v8 }
  0x6d   :  { %604 = vmatprep.subr.bf16.mxu1 %v837_v0  ;;  %619 = vmatpush3.bf16.msra.mxu0 %v676_v14 }
  0x6e   :  { %620 = vmatprep.subr.bf16.mxu0 %v837_v0 }
  0x70   :  { %605 = vmatpush3.bf16.msra.mxu1 %v671_v9 }
  0x71   :  { %606 = vmatprep.subr.bf16.mxu1 %v837_v0  ;;  %621 = vmatpush3.bf16.msra.mxu0 %v677_v15 }
  0x72   :  { %622 = vmatprep.subr.bf16.mxu0 %v837_v0 }
  0x74   :  { %607 = vmatpush3.bf16.msra.mxu1 %v672_v10 }
  0x75   :  { %608 = vmatprep.subr.bf16.mxu1 %v837_v0  ;;  %623 = vmatpush3.bf16.msra.mxu0 %v678_v16 }
  0x76   :  { %624 = vmatprep.subr.bf16.mxu0 %v837_v0 }
  0x78   :  { %609 = vmatpush3.bf16.msra.mxu1 %v673_v11 }
  0x79   :  { %634 = vmatprep.subr.bf16.mxu1 %v837_v0  ;;  %625 = vmatpush3.bf16.msra.mxu0 %v679_v17 }
  0x7a   :  { %626 = vmatprep.subr.bf16.mxu0 %v837_v0 }
  0x7d   :  { %627 = vmatpush3.bf16.msra.mxu0 %v680_v26 }
  0x7e   :  { %628 = vmatprep.subr.bf16.mxu0 %v837_v0 }
  0x81   :  { %629 = vmatpush3.bf16.msra.mxu0 %v681_v27 }
 0x136   :  { %v162_v19 = vpop.f32.mrb[0].mxu0 }
 0x137   :  { %v163_v20 = vadd.f32 %v525_v18, %v162_v19  ;;  %v592_v21 = vpop.f32.mrb[1].mxu0 }
 0x138   :  { %v165_v22 = vpop.f32.mrb[2].mxu0 }
 0x139   :  { %v168_v23 = vmax.f32 %v163_v20, 0.0  ;;  %v593_v24 = vpop.f32.mrb[3].mxu0 }
 0x13b   :  { %v169_v25 = vpack.c.bf16 %v168_v23, %v168_v23 }
 0x13d   :  { %611 = vmatmul.mubr.bf16.vlgmr.msra.gmra.mrb[0].mxu1 %v169_v25 }
 0x13e   :  { %650 = vmatprep.mubr.msk.bf16.mxu1 %vm838_vm0, %v837_v0  ;;  %635 = vmatpush3.bf16.msra.mxu1 %v682_v28 }
 0x13f   :  { %636 = vmatprep.subr.bf16.mxu1 %v837_v0 }
 0x142   :  { %637 = vmatpush3.bf16.msra.mxu1 %v683_v29 }
 0x143   :  { %638 = vmatprep.subr.bf16.mxu1 %v837_v0 }
 0x146   :  { %639 = vmatpush3.bf16.msra.mxu1 %v684_v30 }
 0x147   :  { %640 = vmatprep.subr.bf16.mxu1 %v837_v0 }
 0x14a   :  { %641 = vmatpush3.bf16.msra.mxu1 %v685_v31 }
 0x14b   :  { %642 = vmatprep.subr.bf16.mxu1 %v837_v0 }
 0x14e   :  { %643 = vmatpush3.bf16.msra.mxu1 %v686_v32 }
 0x14f   :  { %644 = vmatprep.subr.bf16.mxu1 %v837_v0 }
 0x152   :  { %645 = vmatpush3.bf16.msra.mxu1 %v687_v33 }
 0x153   :  { %646 = vmatprep.subr.bf16.mxu1 %v837_v0 }
 0x156   :  { %647 = vmatpush3.bf16.msra.mxu1 %v688_v42 }
 0x157   :  { %648 = vmatprep.subr.bf16.mxu1 %v837_v0 }
 0x15a   :  { %649 = vmatpush3.bf16.msra.mxu1 %v689_v43 }
 0x210   :  { %v275_v35 = vpop.f32.mrb[0].mxu1 }
 0x211   :  { %v276_v36 = vadd.f32 %v529_v34, %v275_v35  ;;  %v612_v37 = vpop.f32.mrb[1].mxu1 }
 0x212   :  { %v278_v38 = vpop.f32.mrb[2].mxu1 }
 0x213   :  { %v281_v39 = vmax.f32 %v276_v36, 0.0  ;;  %v613_v40 = vpop.f32.mrb[3].mxu1 }
 0x215   :  { %v282_v41 = vpack.c.bf16 %v281_v39, %v281_v39 }
 0x217   :  { %631 = vmatmul.mubr.bf16.vlgmr.msra.gmra.mrb[4].mxu0 %v282_v41 }
 0x2ea   :  { %v388_v45 = vpop.f32.mrb[4].mxu0 }
 0x2eb   :  { %v389_v46 = vadd.f32 %v538_v44, %v388_v45  ;;  %v632_v47 = vpop.f32.mrb[5].mxu0 }
 0x2ec   :  { %v391_v48 = vpop.f32.mrb[6].mxu0 }
 0x2ed   :  { %v394_v49 = vmax.f32 %v389_v46, 0.0  ;;  %v633_v50 = vpop.f32.mrb[7].mxu0 }
 0x2ef   :  { %v395_v51 = vpack.c.bf16 %v394_v49, %v394_v49 }
 0x2f1   :  { %651 = vmatmul.mubr.bf16.vlgmr.msra.gmra.mrb[4].mxu1 %v395_v51 }
 0x3c4   :  { %v501_v53 = vpop.f32.mrb[4].mxu1 }
 0x3c5   :  { %v502_v54 = vadd.f32 %v547_v52, %v501_v53  ;;  %v652_v55 = vpop.f32.mrb[5].mxu1 }
 0x3c6   :  { %v504_v56 = vpop.f32.mrb[6].mxu1 }
 0x3c7   :  { %507 = vst [vmem:[#allocation11] sm:$0xff] %v502_v54  ;;  %v653_v57 = vpop.f32.mrb[7].mxu1 }
 0x3c8   :  { %811 = shalt.err (!%p808_p2)
}
 0x3c9   :  { %s812_s8 = scalar_lea.hbm %s1029_s9, 128 }
 0x3ca   :  { %p813_p3 = scmp.ne.s32.totalorder %s1029_s9, %s812_s8  ;;  %p816_p4 = scmp.lt.u32.totalorder %s812_s8, %s1029_s9 }
 0x3cc   :  { %p818_p5 = pnand %p816_p4, %p813_p3 }
 0x3ce   :  { %821 = shalt.err (!%p818_p5)
}
 0x3cf   :  { %517 = dma.vmem_to_hbm [thread:$0]  %s515_s12, 128, %s1029_s9, [#allocation4]  }
 0x3d0   :  { %828 = dma.done.wait [#allocation4], 128  }
 0x3d1   :  { %829 = vsyncadd [#allocation4], 4294967168 }
 0x3d2   :  { %521 = vsyncpa [#allocation3], 1 }
 0x3d3   :  { %522 = vsyncpa [#allocation6], 1 }
 0x3d4   :  { %523 = vsyncpa [#allocation9], 1 }
 0x3d5   :  { %524 = vsyncpa [#allocation4], 1 }

</bundles_post_ra>
